<compile_context>
chip_gen: v7x
topology: tpu7x:2x2x1
jax: 0.10.0
libtpu: 0.0.40
codegen_flags: <defaults>
</compile_context>

<pallas_src>
import functools

import jax
import jax.numpy as jnp
from jax import lax
from jax.experimental import pallas as pl
from jax.experimental.pallas import tpu as pltpu


def _triplet_loss_kernel(a_ref, p_ref, n_ref, out_ref, *, margin, need_norm,
                         inv_count):
    # Keep f32 compute (safe on v5e which has no bf16 VPU/EUP; a no-op for f32
    # inputs). bf16 *storage* for DMA is still fine upstream.
    a = a_ref[...].astype(jnp.float32)      # (bb, Dp)
    p = p_ref[...].astype(jnp.float32)      # (bb, Np, Dp)
    n = n_ref[...].astype(jnp.float32)      # (bb, Nn, Dp)

    if need_norm:
        # F.normalize(x, 2, -1): x / max(||x||, 1e-12)
        #   == x * rsqrt(max(||x||^2, 1e-24))   (sqrt is monotone)
        eps2 = 1e-24
        a = a * lax.rsqrt(jnp.maximum(jnp.sum(a * a, axis=-1, keepdims=True), eps2))
        p = p * lax.rsqrt(jnp.maximum(jnp.sum(p * p, axis=-1, keepdims=True), eps2))
        n = n * lax.rsqrt(jnp.maximum(jnp.sum(n * n, axis=-1, keepdims=True), eps2))

    # Hoist the broadcast of the anchor once; reuse for both contractions.
    a3 = a[:, None, :]                       # (bb, 1, Dp)

    # einsum('b d, b n d -> b n') as a batched MXU matmul (q = 1).
    pos_cos = jnp.einsum("bqd,bnd->bqn", a3, p,
                         preferred_element_type=jnp.float32)[:, 0, :]  # (bb, Np)
    neg_cos = jnp.einsum("bqd,bnd->bqn", a3, n,
                         preferred_element_type=jnp.float32)[:, 0, :]  # (bb, Nn)

    pos_dist = 1.0 - pos_cos                 # (bb, Np)
    neg_dist = 1.0 - neg_cos                 # (bb, Nn)

    # relu(pos_dist[:, :, None] - neg_dist[:, None, :] + margin)
    hinge = jnp.maximum(pos_dist[:, :, None] - neg_dist[:, None, :] + margin, 0.0)
    tile_sum = jnp.sum(hinge)

    @pl.when(pl.program_id(0) == 0)
    def _():
        out_ref[0, 0] = jnp.float32(0.0)

    out_ref[0, 0] += tile_sum

    # Finalize: fold the 1/(B*Np*Nn) mean factor in as a compile-time constant.
    @pl.when(pl.program_id(0) == pl.num_programs(0) - 1)
    def _():
        out_ref[0, 0] = out_ref[0, 0] * inv_count


def triplet_loss(anchor, positive, negative, margin=0.3, need_norm=True,
                 block_b=None):
    B, D = anchor.shape
    Bp, Np, Dp_in = positive.shape
    Bn, Nn, Dn_in = negative.shape
    assert Bp == B and Bn == B and Dp_in == D and Dn_in == D

    # Grid over the anchor axis; fall back to one block if it does not divide
    # evenly (keeps the toy shapes on the single-step path).
    if block_b is None or B % block_b != 0:
        block_b = B
    num_tiles = B // block_b

    # Lane-dense layout: pad the embedding axis to a multiple of 128 lanes.
    # Zero padding changes neither the norms nor the dot products.
    Dp = 128 * pl.cdiv(D, 128)
    if Dp != D:
        anchor = jnp.pad(anchor, ((0, 0), (0, Dp - D)))
        positive = jnp.pad(positive, ((0, 0), (0, 0), (0, Dp - D)))
        negative = jnp.pad(negative, ((0, 0), (0, 0), (0, Dp - D)))

    kernel = functools.partial(
        _triplet_loss_kernel,
        margin=float(margin),
        need_norm=bool(need_norm),
        inv_count=1.0 / float(B * Np * Nn),
    )

    out = pl.pallas_call(
        kernel,
        out_shape=jax.ShapeDtypeStruct((1, 1), jnp.float32),
        grid=(num_tiles,),
        in_specs=[
            pl.BlockSpec((block_b, Dp), lambda i: (i, 0)),
            pl.BlockSpec((block_b, Np, Dp), lambda i: (i, 0, 0)),
            pl.BlockSpec((block_b, Nn, Dp), lambda i: (i, 0, 0)),
        ],
        # (1,1) SMEM scalar output, resident across the whole grid (accumulator).
        out_specs=pl.BlockSpec((1, 1), lambda i: (0, 0),
                               memory_space=pltpu.SMEM),
        compiler_params=pltpu.CompilerParams(
            # Scalar accumulator is revisited across B tiles -> "arbitrary".
            dimension_semantics=("arbitrary",),
            # Explicit scoped-VMEM limit; conservative for v7x's 64 MiB VMEM.
            vmem_limit_bytes=32 * 1024 * 1024,
        ),
    )(anchor, positive, negative)
    return out[0, 0]


def _reference_triplet_loss(a, p, n, margin=0.3):
    eps = 1e-12
    a = a / jnp.maximum(jnp.linalg.norm(a, axis=-1, keepdims=True), eps)
    p = p / jnp.maximum(jnp.linalg.norm(p, axis=-1, keepdims=True), eps)
    n = n / jnp.maximum(jnp.linalg.norm(n, axis=-1, keepdims=True), eps)
    pos_dist = 1.0 - jnp.einsum("bd,bnd->bn", a, p)
    neg_dist = 1.0 - jnp.einsum("bd,bnd->bn", a, n)
    return jnp.mean(
        jnp.maximum(pos_dist[:, :, None] - neg_dist[:, None, :] + margin, 0.0)
    )


if __name__ == "__main__":
    # TripletLoss has no trainable parameters; only the margin hyperparameter.
    B, Np, Nn, D = 2, 4, 8, 32
    key = jax.random.PRNGKey(0)
    k1, k2, k3 = jax.random.split(key, 3)
    anchor = jax.random.normal(k1, (B, D), dtype=jnp.float32)
    positive = jax.random.normal(k2, (B, Np, D), dtype=jnp.float32)
    negative = jax.random.normal(k3, (B, Nn, D), dtype=jnp.float32)

    loss = jax.block_until_ready(triplet_loss(anchor, positive, negative, margin=0.3))
    expected = _reference_triplet_loss(anchor, positive, negative, margin=0.3)
    assert jnp.allclose(loss, expected, atol=1e-5, rtol=1e-5), (loss, expected)

    # Also exercise the B-tiled (multi grid-step) accumulation path.
    B2 = 16
    k4, k5, k6 = jax.random.split(jax.random.PRNGKey(1), 3)
    a2 = jax.random.normal(k4, (B2, D), dtype=jnp.float32)
    p2 = jax.random.normal(k5, (B2, Np, D), dtype=jnp.float32)
    n2 = jax.random.normal(k6, (B2, Nn, D), dtype=jnp.float32)
    loss2 = jax.block_until_ready(triplet_loss(a2, p2, n2, margin=0.3, block_b=8))
    expected2 = _reference_triplet_loss(a2, p2, n2, margin=0.3)
    assert jnp.allclose(loss2, expected2, atol=1e-5, rtol=1e-5), (loss2, expected2)

    print("KERNEL_OK")
</pallas_src>

<mosaic_0001>
module attributes {stable_mosaic.version = 11 : i64} {
  func.func @_triplet_loss_kernel(%arg0: i32, %arg1: memref<2x128xf32, #tpu.memory_space<vmem>>, %arg2: memref<2x4x128xf32, #tpu.memory_space<vmem>>, %arg3: memref<2x8x128xf32, #tpu.memory_space<vmem>>, %arg4: memref<1x1xf32, #tpu.memory_space<smem>>) attributes {dimension_semantics = [#tpu.dimension_semantics<arbitrary>], iteration_bounds = array<i64: 1>, scalar_prefetch = 0 : i64, scratch_operands = 0 : i64, tpu.core_type = #tpu.core_type<tc>, window_params = [{transform_indices = @transform_0, window_bounds = array<i64: 2, 128>}, {transform_indices = @transform_1, window_bounds = array<i64: 2, 4, 128>}, {transform_indices = @transform_2, window_bounds = array<i64: 2, 8, 128>}, {transform_indices = @transform_3, window_bounds = array<i64: 1, 1>}]} {
    %c0 = arith.constant 0 : index
    %c0_0 = arith.constant 0 : index
    %0 = vector.load %arg1[%c0, %c0_0] : memref<2x128xf32, #tpu.memory_space<vmem>>, vector<2x128xf32>
    %c0_1 = arith.constant 0 : index
    %c0_2 = arith.constant 0 : index
    %c0_3 = arith.constant 0 : index
    %1 = vector.load %arg2[%c0_1, %c0_2, %c0_3] : memref<2x4x128xf32, #tpu.memory_space<vmem>>, vector<2x4x128xf32>
    %c0_4 = arith.constant 0 : index
    %c0_5 = arith.constant 0 : index
    %c0_6 = arith.constant 0 : index
    %2 = vector.load %arg3[%c0_4, %c0_5, %c0_6] : memref<2x8x128xf32, #tpu.memory_space<vmem>>, vector<2x8x128xf32>
    %3 = arith.mulf %0, %0 : vector<2x128xf32>
    %cst = arith.constant dense<0.000000e+00> : vector<2xf32>
    %4 = vector.multi_reduction <add>, %3, %cst [1] : vector<2x128xf32> to vector<2xf32>
    %5 = vector.shape_cast %4 : vector<2xf32> to vector<2x1xf32>
    %cst_7 = arith.constant 1.000000e-24 : f32
    %6 = vector.broadcast %cst_7 : f32 to vector<2x1xf32>
    %7 = arith.maximumf %5, %6 : vector<2x1xf32>
    %8 = math.rsqrt %7 : vector<2x1xf32>
    %9 = vector.broadcast %8 : vector<2x1xf32> to vector<2x128xf32>
    %10 = arith.mulf %0, %9 : vector<2x128xf32>
    %11 = arith.mulf %1, %1 : vector<2x4x128xf32>
    %cst_8 = arith.constant dense<0.000000e+00> : vector<2x4xf32>
    %12 = vector.multi_reduction <add>, %11, %cst_8 [2] : vector<2x4x128xf32> to vector<2x4xf32>
    %13 = vector.shape_cast %12 : vector<2x4xf32> to vector<2x4x1xf32>
    %cst_9 = arith.constant 1.000000e-24 : f32
    %14 = vector.broadcast %cst_9 : f32 to vector<2x4x1xf32>
    %15 = arith.maximumf %13, %14 : vector<2x4x1xf32>
    %16 = math.rsqrt %15 : vector<2x4x1xf32>
    %17 = vector.broadcast %16 : vector<2x4x1xf32> to vector<2x4x128xf32>
    %18 = arith.mulf %1, %17 : vector<2x4x128xf32>
    %19 = arith.mulf %2, %2 : vector<2x8x128xf32>
    %cst_10 = arith.constant dense<0.000000e+00> : vector<2x8xf32>
    %20 = vector.multi_reduction <add>, %19, %cst_10 [2] : vector<2x8x128xf32> to vector<2x8xf32>
    %21 = vector.shape_cast %20 : vector<2x8xf32> to vector<2x8x1xf32>
    %cst_11 = arith.constant 1.000000e-24 : f32
    %22 = vector.broadcast %cst_11 : f32 to vector<2x8x1xf32>
    %23 = arith.maximumf %21, %22 : vector<2x8x1xf32>
    %24 = math.rsqrt %23 : vector<2x8x1xf32>
    %25 = vector.broadcast %24 : vector<2x8x1xf32> to vector<2x8x128xf32>
    %26 = arith.mulf %2, %25 : vector<2x8x128xf32>
    %27 = vector.shape_cast %10 : vector<2x128xf32> to vector<2x1x128xf32>
    "tpu.trace_start"() <{level = 10 : i32, message = "bqd,bnd->bqn"}> : () -> ()
    %cst_12 = arith.constant dense<0.000000e+00> : vector<2x1x4xf32>
    %28 = tpu.matmul %27, %18, %cst_12 {dimension_numbers = #tpu.dot_dimension_numbers<[2], [2], [1], [1], [0, 0, 0, 1, 1, 1], [0], [0]>} : vector<2x1x128xf32>, vector<2x4x128xf32>, vector<2x1x4xf32> -> vector<2x1x4xf32>
    "tpu.trace_stop"() : () -> ()
    %29 = vector.shape_cast %28 : vector<2x1x4xf32> to vector<2x4xf32>
    "tpu.trace_start"() <{level = 10 : i32, message = "bqd,bnd->bqn"}> : () -> ()
    %cst_13 = arith.constant dense<0.000000e+00> : vector<2x1x8xf32>
    %30 = tpu.matmul %27, %26, %cst_13 {dimension_numbers = #tpu.dot_dimension_numbers<[2], [2], [1], [1], [0, 0, 0, 1, 1, 1], [0], [0]>} : vector<2x1x128xf32>, vector<2x8x128xf32>, vector<2x1x8xf32> -> vector<2x1x8xf32>
    "tpu.trace_stop"() : () -> ()
    %31 = vector.shape_cast %30 : vector<2x1x8xf32> to vector<2x8xf32>
    %cst_14 = arith.constant 1.000000e+00 : f32
    %32 = vector.broadcast %cst_14 : f32 to vector<2x4xf32>
    %33 = arith.subf %32, %29 : vector<2x4xf32>
    %cst_15 = arith.constant 1.000000e+00 : f32
    %34 = vector.broadcast %cst_15 : f32 to vector<2x8xf32>
    %35 = arith.subf %34, %31 : vector<2x8xf32>
    %36 = vector.shape_cast %33 : vector<2x4xf32> to vector<2x4x1xf32>
    %37 = vector.shape_cast %35 : vector<2x8xf32> to vector<2x1x8xf32>
    %38 = vector.broadcast %36 : vector<2x4x1xf32> to vector<2x4x8xf32>
    %39 = vector.broadcast %37 : vector<2x1x8xf32> to vector<2x4x8xf32>
    %40 = arith.subf %38, %39 : vector<2x4x8xf32>
    %cst_16 = arith.constant 3.000000e-01 : f32
    %41 = vector.broadcast %cst_16 : f32 to vector<2x4x8xf32>
    %42 = arith.addf %40, %41 : vector<2x4x8xf32>
    %cst_17 = arith.constant 0.000000e+00 : f32
    %43 = vector.broadcast %cst_17 : f32 to vector<2x4x8xf32>
    %44 = arith.maximumf %42, %43 : vector<2x4x8xf32>
    %45 = vector.shape_cast %44 : vector<2x4x8xf32> to vector<1x2x4x8xf32>
    %cst_18 = arith.constant dense<0.000000e+00> : vector<1xf32>
    %46 = vector.multi_reduction <add>, %45, %cst_18 [1, 2, 3] : vector<1x2x4x8xf32> to vector<1xf32>
    %47 = vector.shape_cast %46 : vector<1xf32> to vector<1x1x1x1xf32>
    %48 = vector.extract %47[0, 0, 0, 0] : f32 from vector<1x1x1x1xf32>
    %c0_i32 = arith.constant 0 : i32
    %49 = arith.cmpi eq, %arg0, %c0_i32 : i32
    %50 = arith.extui %49 : i1 to i32
    %c0_i32_19 = arith.constant 0 : i32
    %51 = arith.cmpi ne, %50, %c0_i32_19 : i32
    scf.if %51 {
      %cst_26 = arith.constant 0.000000e+00 : f32
      %c0_27 = arith.constant 0 : index
      %c0_28 = arith.constant 0 : index
      %58 = memref.load %arg4[%c0_27, %c0_28] : memref<1x1xf32, #tpu.memory_space<smem>>
      memref.store %cst_26, %arg4[%c0_27, %c0_28] : memref<1x1xf32, #tpu.memory_space<smem>>
    } else {
    }
    %c0_20 = arith.constant 0 : index
    %c0_21 = arith.constant 0 : index
    %52 = memref.load %arg4[%c0_20, %c0_21] : memref<1x1xf32, #tpu.memory_space<smem>>
    %53 = arith.addf %52, %48 : f32
    %c0_22 = arith.constant 0 : index
    %c0_23 = arith.constant 0 : index
    %54 = memref.load %arg4[%c0_22, %c0_23] : memref<1x1xf32, #tpu.memory_space<smem>>
    memref.store %53, %arg4[%c0_22, %c0_23] : memref<1x1xf32, #tpu.memory_space<smem>>
    %c0_i32_24 = arith.constant 0 : i32
    %55 = arith.cmpi eq, %arg0, %c0_i32_24 : i32
    %56 = arith.extui %55 : i1 to i32
    %c0_i32_25 = arith.constant 0 : i32
    %57 = arith.cmpi ne, %56, %c0_i32_25 : i32
    scf.if %57 {
      %c0_26 = arith.constant 0 : index
      %c0_27 = arith.constant 0 : index
      %58 = memref.load %arg4[%c0_26, %c0_27] : memref<1x1xf32, #tpu.memory_space<smem>>
      %cst_28 = arith.constant 1.562500e-02 : f32
      %59 = arith.mulf %58, %cst_28 : f32
      %c0_29 = arith.constant 0 : index
      %c0_30 = arith.constant 0 : index
      %60 = memref.load %arg4[%c0_29, %c0_30] : memref<1x1xf32, #tpu.memory_space<smem>>
      memref.store %59, %arg4[%c0_29, %c0_30] : memref<1x1xf32, #tpu.memory_space<smem>>
    } else {
    }
    return
  }
  func.func @transform_0(%arg0: i32) -> (i32, i32) {
    %c0_i32 = arith.constant 0 : i32
    %c0_i32_0 = arith.constant 0 : i32
    return %arg0, %c0_i32 : i32, i32
  }
  func.func @transform_1(%arg0: i32) -> (i32, i32, i32) {
    %c0_i32 = arith.constant 0 : i32
    %c0_i32_0 = arith.constant 0 : i32
    %c0_i32_1 = arith.constant 0 : i32
    return %arg0, %c0_i32, %c0_i32_0 : i32, i32, i32
  }
  func.func @transform_2(%arg0: i32) -> (i32, i32, i32) {
    %c0_i32 = arith.constant 0 : i32
    %c0_i32_0 = arith.constant 0 : i32
    %c0_i32_1 = arith.constant 0 : i32
    return %arg0, %c0_i32, %c0_i32_0 : i32, i32, i32
  }
  func.func @transform_3(%arg0: i32) -> (i32, i32) {
    %c0_i32 = arith.constant 0 : i32
    %c0_i32_0 = arith.constant 0 : i32
    %c0_i32_1 = arith.constant 0 : i32
    return %c0_i32, %c0_i32_0 : i32, i32
  }
}

</mosaic_0001>

<bundles_post_ra>
// kernel: tpu_custom_call.1
= control target key start
LH: loop header
LB: loop body
LE: loop exit
PB: predicated region body
PF: predicated region fallthrough
CT: control target
= control target key end

     0   :  { %8 = vsyncpa [#allocation3], 0  ;;  %s692_s0 = inlined_call_operand.hbm [shape: f32[2,128], index: 0, kind: input, shape index: {}]   ;;  %s693_s1 = inlined_call_operand.hbm [shape: f32[2,4,128], index: 1, kind: input, shape index: {}]   ;;  %s694_s2 = inlined_call_operand.hbm [shape: f32[2,8,128], index: 2, kind: input, shape index: {}]   ;;  %s695_s3 = inlined_call_operand.hbm [shape: f32[1,1], index: 3, kind: output, shape index: {}]  }
   0x1   :  { %9 = vsyncpa [#allocation6], 0 }
   0x2   :  { %10 = vsyncpa [#allocation4], 0  ;;  %s609_s12 = smov [#allocation5]   ;;  %s527_s16 = scalar_lea.hbm %s693_s1, 128 }
   0x3   :  { %s26_s13 = sshll.u32 %s609_s12, 4  ;;  %p528_p0 = scmp.ne.s32.totalorder %s693_s1, %s527_s16  ;;  %s27_s13 = int_to_ptr.vmem [resolvable:$true] %s26_s13 }
   0x4   :  { %p531_p1 = scmp.lt.u32.totalorder %s527_s16, %s693_s1 }
   0x6   :  { %p533_p2 = pnand %p531_p1, %p528_p0 }
   0x8   :  { %536 = shalt.err (!%p533_p2)
}
   0x9   :  { %s537_s21 = scalar_lea.vmem %s27_s13, 128  ;;  %p542_p4 = scmp.lt.s32.totalorder %s27_s13, %s27_s13 }
   0xa   :  { %p538_p3 = scmp.ne.s32.totalorder %s27_s13, %s537_s21  ;;  %p543_p5 = scmp.lt.s32.totalorder %s537_s21, %s537_s21 }
   0xc   :  { %p544_p6 = por %p543_p5, %p542_p4 }
   0xe   :  { %p545_p7 = pnand %p544_p6, %p538_p3 }
  0x10   :  { %548 = shalt.err (!%p545_p7)
}
  0x11   :  { %s610_s22 = smov 64   ;;  %s611_s23 = smov 4  }
  0x12   :  { %32 = dma.hbm_to_vmem [thread:$0]  %s693_s1, 128, %s27_s13, [#allocation6], %s610_s22, %s610_s22, %s611_s23  }
  0x13   :  { %s612_s26 = smov [#allocation2]   ;;  %s613_s28 = smov [#allocation7]  }
  0x14   :  { %s17_s27 = sshll.u32 %s612_s26, 4  ;;  %s38_s29 = sshll.u32 %s613_s28, 4  ;;  %s18_s27 = int_to_ptr.vmem [resolvable:$true] %s17_s27  ;;  %s39_s29 = int_to_ptr.vmem [resolvable:$true] %s38_s29 }
  0x15   :  { %s549_s5 = scalar_lea.hbm %s692_s0, 32 }
  0x16   :  { %p550_p8 = scmp.ne.s32.totalorder %s692_s0, %s549_s5  ;;  %p553_p9 = scmp.lt.u32.totalorder %s549_s5, %s692_s0 }
  0x18   :  { %p555_p10 = pnand %p553_p9, %p550_p8 }
  0x1a   :  { %558 = shalt.err (!%p555_p10)
}
  0x1b   :  { %s559_s1 = scalar_lea.vmem %s18_s27, 32  ;;  %p564_p12 = scmp.lt.s32.totalorder %s18_s27, %s18_s27 }
  0x1c   :  { %p560_p11 = scmp.ne.s32.totalorder %s18_s27, %s559_s1  ;;  %p565_p13 = scmp.lt.s32.totalorder %s559_s1, %s559_s1 }
  0x1e   :  { %p566_p0 = por %p565_p13, %p564_p12 }
  0x20   :  { %p567_p1 = pnand %p566_p0, %p560_p11 }
  0x22   :  { %570 = shalt.err (!%p567_p1)
}
  0x23   :  { %20 = dma.hbm_to_vmem [thread:$0]  %s692_s0, 32, %s18_s27, [#allocation3]  }
  0x24   :  { %s571_s14 = scalar_lea.hbm %s694_s2, 256 }
  0x25   :  { %p572_p2 = scmp.ne.s32.totalorder %s694_s2, %s571_s14  ;;  %p575_p3 = scmp.lt.u32.totalorder %s571_s14, %s694_s2 }
  0x27   :  { %p577_p4 = pnand %p575_p3, %p572_p2 }
  0x29   :  { %580 = shalt.err (!%p577_p4)
}
  0x2a   :  { %s581_s19 = scalar_lea.vmem %s39_s29, 256  ;;  %p586_p6 = scmp.lt.s32.totalorder %s39_s29, %s39_s29 }
  0x2b   :  { %p582_p5 = scmp.ne.s32.totalorder %s39_s29, %s581_s19  ;;  %p587_p7 = scmp.lt.s32.totalorder %s581_s19, %s581_s19 }
  0x2d   :  { %p588_p8 = por %p587_p7, %p586_p6 }
  0x2f   :  { %p589_p9 = pnand %p588_p8, %p582_p5 }
  0x31   :  { %592 = shalt.err (!%p589_p9)
}
  0x32   :  { %s614_s0 = smov 128   ;;  %s615_s20 = smov 8  }
  0x33   :  { %44 = dma.hbm_to_vmem [thread:$0]  %s694_s2, 256, %s39_s29, [#allocation6], %s614_s0, %s614_s0, %s615_s20  }
  0x34   :  { %603 = dma.done.wait [#allocation3], 32  }
  0x35   :  { %604 = vsyncadd [#allocation3], 4294967264 }
  0x36   :  { %605 = dma.done.wait [#allocation6], 384  }
  0x37   :  { %606 = vsyncadd [#allocation6], 4294966912  ;;  %vm60_vm0 = vcmask 1041408   ;;  %vm69_vm1 = vcmask 1043456   ;;  %v54_v0 = vld [vmem:[#allocation2] sm:$0x3]  ;;  %v98_v22 = vlaneseq }
  0x38   :  { %v56_v1 = vld [vmem:[#allocation5 + $0x4] sm:$0xf]  ;;  %v55_v2 = vld [vmem:[#allocation5] sm:$0xf]  ;;  %v59_v3 = vmul.f32 %v54_v0, %v54_v0  ;;  %v57_v6 = vld [vmem:[#allocation7] sm:$0xff]  ;;  %v616_v13 = vmov 0.0  }
  0x39   :  { %v68_v4 = vmul.f32 %v56_v1, %v56_v1  ;;  %v67_v5 = vmul.f32 %v55_v2, %v55_v2  ;;  %v82_v9 = vmul.f32 %v57_v6, %v57_v6  ;;  %v58_v11 = vld [vmem:[#allocation7 + $0x8] sm:$0xff]  ;;  %488 = vmatprep.subr.mxu1 %v616_v13  ;;  %483 = vmatprep.subr.mxu0 %v616_v13  ;;  %vm617_vm2 = vmmov 0   ;;  %s593_s26 = scalar_lea.hbm %s695_s3, 16 }
  0x3a   :  { %v61_v7 = vsel %vm60_vm0, %v59_v3, 0.0  ;;  %v83_v12 = vmul.f32 %v58_v11, %v58_v11  ;;  %490 = vmatprep.mubr.msk.f32.mxu1 %vm617_vm2, %v616_v13  ;;  %485 = vmatprep.mubr.msk.f32.mxu0 %vm617_vm2, %v616_v13  ;;  %v618_v20 = vmov 1966171168   ;;  %v99_v27 = vshrl.u32 %v98_v22, 7  ;;  %p594_p10 = scmp.ne.s32.totalorder %s695_s3, %s593_s26  ;;  %p597_p11 = scmp.lt.u32.totalorder %s593_s26, %s695_s3 }
  0x3b   :  { %v73_v8 = vsel %vm69_vm1, %v68_v4, 0.0  ;;  %62 = vadd.xlane.f32.xlu0 %v61_v7  ;;  %v70_v10 = vsel %vm69_vm1, %v67_v5, 0.0  ;;  %v96_v21 = vunpack.c.l.s4 %v618_v20  ;;  %vm431_vm3 = vcmask 60416  }
  0x3c   :  { %74 = vadd.xlane.f32.xlu1 %v73_v8  ;;  %v405_v44 = vsub.s32 0, %v99_v27  ;;  %p599_p12 = pnand %p597_p11, %p594_p10 }
  0x3d   :  { %v97_v26 = vunpack.c.0.s8 %v96_v21 }
  0x3f   :  { %71 = vadd.xlane.f32.xlu0 %v70_v10  ;;  %v100_v29 = vsub.s32 %v97_v26, %v99_v27 }
  0x40   :  { %84 = vadd.xlane.f32.xlu1 %v82_v9 }
  0x43   :  { %86 = vadd.xlane.f32.xlu0 %v83_v12 }
  0xc8   :  { %v63_v14 = vpop.xlane.xlu0 %62 }
  0xc9   :  { %v75_v15 = vpop.xlane.xlu1 %74  ;;  %v64_v16 = vmax.f32 %v63_v14, 1e-24 }
  0xca   :  { %v77_v17 = vmax.f32 %v75_v15, 1e-24 }
  0xcb   :  { %517 = vrsqrt.f32 %v64_v16 }
  0xcc   :  { %519 = vrsqrt.f32 %v77_v17  ;;  %v72_v18 = vpop.xlane.xlu0 %71 }
  0xcd   :  { %v85_v19 = vpop.xlane.xlu1 %84  ;;  %v76_v23 = vmax.f32 %v72_v18, 1e-24 }
  0xce   :  { %v88_v24 = vmax.f32 %v85_v19, 1e-24 }
  0xcf   :  { %521 = vrsqrt.f32 %v76_v23 }
  0xd0   :  { %523 = vrsqrt.f32 %v88_v24  ;;  %v87_v25 = vpop.xlane.xlu0 %86 }
  0xd1   :  { %v89_v28 = vmax.f32 %v87_v25, 1e-24 }
  0xd3   :  { %525 = vrsqrt.f32 %v89_v28 }
  0xd5   :  { %v518_v30 = vpop.eup %517 }
  0xd6   :  { %v520_v31 = vpop.eup %519  ;;  %v66_v32 = vmul.f32 %v518_v30, %v54_v0 }
  0xd7   :  { %v81_v33 = vmul.f32 %v520_v31, %v56_v1 }
  0xd8   :  { %v101_v34 = vrot.slane %v66_v32, %v100_v29 }
  0xd9   :  { %v522_v35 = vpop.eup %521  ;;  %489 = vmatpush3.xpose.msra.mxu1 %v81_v33 }
  0xda   :  { %v524_v36 = vpop.eup %523  ;;  %v80_v37 = vmul.f32 %v522_v35, %v55_v2  ;;  %v102_v38 = vcombine.high %v101_v34, %v101_v34  ;;  %498 = vmatprep.subr.mxu1 %v616_v13  ;;  %v109_v42 = vrot.slane %v101_v34, %v100_v29 }
  0xdb   :  { %v92_v40 = vmul.f32 %v524_v36, %v57_v6 }
  0xdc   :  { %484 = vmatpush3.xpose.msra.mxu0 %v80_v37  ;;  %v116_v39 = vrot.slane %v102_v38, %v100_v29 }
  0xdd   :  { %v526_v41 = vpop.eup %525  ;;  %493 = vmatprep.subr.mxu0 %v616_v13 }
  0xde   :  { %491 = vmatmul.mubr.f32.vlgmr.msra.gmra.mrb[0].mxu1 %v116_v39  ;;  %v93_v43 = vmul.f32 %v526_v41, %v58_v11 }
  0xdf   :  { %486 = vmatmul.mubr.f32.vlgmr.msra.gmra.mrb[0].mxu0 %v109_v42  ;;  %500 = vmatprep.mubr.msk.f32.mxu1 %vm617_vm2, %v616_v13 }
  0xe0   :  { %494 = vmatpush3.xpose.msra.mxu0 %v92_v40  ;;  %499 = vmatpush3.xpose.msra.mxu1 %v93_v43 }
  0xe1   :  { %495 = vmatprep.mubr.msk.f32.mxu0 %vm617_vm2, %v616_v13 }
  0xe3   :  { %496 = vmatmul.mubr.f32.vlgmr.msra.gmra.mrb[2].mxu0 %v109_v42  ;;  %501 = vmatmul.mubr.f32.vlgmr.msra.gmra.mrb[2].mxu1 %v116_v39 }
 0x1b1   :  { %v255_v45 = vpop.f32.mrb[0].mxu1 }
 0x1b2   :  { %v400_v46 = vsub.f32 1.0, %v255_v45  ;;  %v185_v47 = vpop.f32.mrb[0].mxu0  ;;  %v492_v48 = vpop.f32.mrb[1].mxu1 }
 0x1b3   :  { %v399_v49 = vsub.f32 1.0, %v185_v47  ;;  %v487_v50 = vpop.f32.mrb[1].mxu0 }
 0x1b4   :  { %v413_v51 = vrot.slane %v400_v46, %v405_v44 }
 0x1b5   :  { %v406_v52 = vrot.slane %v399_v49, %v405_v44 }
 0x1b6   :  { %415 = vbcast.lane.b32.xlu0 %v413_v51, 256  ;;  %v325_v53 = vpop.f32.mrb[2].mxu0  ;;  %v395_v54 = vpop.f32.mrb[2].mxu1 }
 0x1b7   :  { %v401_v55 = vsub.f32 1.0, %v325_v53  ;;  %v402_v56 = vsub.f32 1.0, %v395_v54  ;;  %408 = vbcast.lane.b32.xlu1 %v406_v52, 256  ;;  %v497_v57 = vpop.f32.mrb[3].mxu0  ;;  %v502_v58 = vpop.f32.mrb[3].mxu1 }
 0x1b9   :  { %v424_v59 = vrot.slane %v402_v56, %v405_v44  ;;  %v420_v60 = vrot.slane %v401_v55, %v405_v44 }
 0x228   :  { %v416_v61 = vpop.permute.xlu0 %415 }
 0x229   :  { %v426_v62 = vsub.f32 %v416_v61, %v424_v59  ;;  %v409_v63 = vpop.permute.xlu1 %408 }
 0x22a   :  { %v425_v0 = vsub.f32 %v409_v63, %v420_v60 }
 0x22b   :  { %v428_v1 = vadd.f32 0.3, %v426_v62 }
 0x22c   :  { %v427_v2 = vadd.f32 0.3, %v425_v0 }
 0x22d   :  { %v430_v3 = vmax.f32 %v428_v1, 0.0 }
 0x22e   :  { %v429_v4 = vmax.f32 %v427_v2, 0.0 }
 0x22f   :  { %v433_v5 = vsel %vm431_vm3, %v430_v3, 0.0 }
 0x230   :  { %v432_v6 = vsel %vm431_vm3, %v429_v4, 0.0 }
 0x231   :  { %v434_v7 = vadd.f32 %v433_v5, %v432_v6 }
 0x233   :  { %435 = vadd.xlane.f32.xlu1 %v434_v7 }
 0x2c0   :  { %v436_v8 = vpop.xlane.xlu1 %435 }
 0x2c1   :  { %v437_v9 = vrot.slane %v436_v8, 4 }
 0x2c3   :  { %v438_v10 = vadd.f32 %v437_v9, %v436_v8 }
 0x2c5   :  { %v439_v11 = vrot.slane %v438_v10, 2 }
 0x2c7   :  { %v440_v12 = vadd.f32 %v439_v11, %v438_v10 }
 0x2c9   :  { %v441_v13 = vrot.slane %v440_v12, 1 }
 0x2cb   :  { %v442_v14 = vadd.f32 %v441_v13, %v440_v12 }
 0x2cd   :  { %503 = vpush %v442_v14 }
 0x2fe   :  { %s504_s2 = spop %503 }
 0x2ff   :  { %s458_s23 = smul.f32 0.015625, %s504_s2 }
 0x301   :  { %459 = sst [smem:[#allocation8]] %s458_s23 }
 0x302   :  { %602 = shalt.err (!%p599_p12)
}
 0x303   :  { %s619_s4 = smov [#allocation8]  }
 0x304   :  { %467 = dma.smem_to_hbm %s619_s4, 16, %s695_s3, [#allocation4]  }
 0x305   :  { %607 = dma.done.wait [#allocation4], 16  }
 0x306   :  { %608 = vsyncadd [#allocation4], 4294967280 }
 0x307   :  { %471 = sfence }
 0x308   :  { %472 = vsyncpa [#allocation3], 1 }
 0x309   :  { %473 = vsyncpa [#allocation6], 1 }
 0x30a   :  { %474 = vsyncpa [#allocation4], 1 }

</bundles_post_ra>
